<compile_context>
chip_gen: v7x
topology: tpu7x:2x2x1
jax: 0.10.0
libtpu: 0.0.40
codegen_flags: <defaults>
</compile_context>

<pallas_src>
import functools

import jax
import jax.numpy as jnp
from jax.experimental import pallas as pl
from jax.experimental.pallas import tpu as pltpu


def _round_up(x, m):
    return (x + m - 1) // m * m


def _pick_tile(dim, pref, align=128):
    """Prefer a large 256-multiple tile for big dims, else round dim up."""
    return pref if dim >= pref else _round_up(max(dim, 1), align)


def _gemm_bias_relu_kernel(p_ref, w_ref, bias_ref, o_ref, acc_ref, *, relu6):
    """(tm, tk)bf16 @ (tk, tn)bf16 on the MXU, f32 K-accumulation in VMEM,
    fused folded-BN bias + ReLU/ReLU6 epilogue on the last K step."""
    k = pl.program_id(2)

    @pl.when(k == 0)
    def _init():
        acc_ref[...] = jnp.zeros_like(acc_ref)

    acc_ref[...] += jnp.dot(p_ref[...], w_ref[...],
                            preferred_element_type=jnp.float32)

    @pl.when(k == pl.num_programs(2) - 1)
    def _finalize():
        y = acc_ref[...] + bias_ref[...]
        y = jnp.maximum(y, 0.0)
        if relu6:
            y = jnp.minimum(y, 6.0)
        o_ref[...] = y.astype(o_ref.dtype)


def conv_bn_relu(x_nchw, weight, gamma, beta, running_mean, running_var,
                 stride=1, padding=0, dilation=1, relu6=False, eps=1e-5,
                 out_dtype=jnp.float32):
    """Conv2d(bias=False, groups=1) + BatchNorm2d(eval) + ReLU(6). NCHW in/out."""
    N, Cin, H, W = x_nchw.shape
    Cout, Cin_w, KH, KW = weight.shape
    assert Cin_w == Cin, "only groups=1 supported"
    # TODO(synk): grouped / depthwise convolution (groups > 1) not implemented.

    Ho = (H + 2 * padding - dilation * (KH - 1) - 1) // stride + 1
    Wo = (W + 2 * padding - dilation * (KW - 1) - 1) // stride + 1

    # NCHW -> NHWC, cast to bf16 up front (halves im2col HBM traffic; the MXU
    # consumes bf16 anyway), zero-pad spatial dims.
    x = jnp.transpose(x_nchw, (0, 2, 3, 1)).astype(jnp.bfloat16)
    if padding > 0:
        x = jnp.pad(x, ((0, 0), (padding, padding), (padding, padding), (0, 0)))

    # im2col (glue): K axis ordered as (kh, kw, ci); 1x1 convs are a pure
    # strided slice + reshape (no concatenate / extra copy).
    cols = []
    for kh in range(KH):
        for kw in range(KW):
            h0 = kh * dilation
            w0 = kw * dilation
            sl = x[:, h0:h0 + (Ho - 1) * stride + 1:stride,
                   w0:w0 + (Wo - 1) * stride + 1:stride, :]
            cols.append(sl)
    patches = cols[0] if len(cols) == 1 else jnp.concatenate(cols, axis=-1)
    M = N * Ho * Wo
    K = KH * KW * Cin
    patches = patches.reshape(M, K)
    # TODO(synk): for KH*KW > 1 the im2col matrix is still materialized in HBM;
    # a fully fused variant would stream the NHWC input (memory_space=pl.ANY)
    # and accumulate the kh,kw taps inside the kernel.

    # Fold eval-mode BatchNorm: scale goes into the weights (in f32, before the
    # bf16 cast), bias stays as an f32 epilogue add.
    inv_std = 1.0 / jnp.sqrt(running_var.astype(jnp.float32) + eps)
    scale = gamma.astype(jnp.float32) * inv_std                       # (Cout,)
    bias = beta.astype(jnp.float32) - running_mean.astype(jnp.float32) * scale

    # weight (Cout, Cin, KH, KW) * scale -> (KH, KW, Cin, Cout) -> (K, Cout).
    w_folded = weight.astype(jnp.float32) * scale[:, None, None, None]
    w_mat = jnp.transpose(w_folded, (2, 3, 1, 0)).reshape(K, Cout)
    w_mat = w_mat.astype(jnp.bfloat16)

    # Tile plan: large M tile, N and K grid axes; 256-aligned for v6e/v7x MXU.
    tm = _pick_tile(M, 512)
    tk = _pick_tile(K, 512)
    tn = _pick_tile(Cout, 256)
    M_pad = _round_up(M, tm)
    K_pad = _round_up(K, tk)
    N_pad = _round_up(Cout, tn)

    patches_p = jnp.pad(patches, ((0, M_pad - M), (0, K_pad - K)))
    w_p = jnp.pad(w_mat, ((0, K_pad - K), (0, N_pad - Cout)))
    bias_p = jnp.pad(bias, (0, N_pad - Cout)).reshape(1, N_pad)

    grid = (M_pad // tm, N_pad // tn, K_pad // tk)

    out_bytes = jnp.dtype(out_dtype).itemsize
    # double-buffered bf16 inputs + bias + output + f32 accumulator.
    block_vmem = (2 * tm * tk * 2 + 2 * tk * tn * 2 + 2 * 8 * tn * 4
                  + 2 * tm * tn * out_bytes + tm * tn * 4)
    vmem_limit = int(min(48 * 1024 * 1024,
                         max(2 * block_vmem, 32 * 1024 * 1024)))

    cost = pl.CostEstimate(
        flops=2 * M_pad * K_pad * N_pad,
        transcendentals=0,
        bytes_accessed=int(M_pad * K_pad * 2 + K_pad * N_pad * 2
                           + M_pad * N_pad * out_bytes),
    )

    kernel = functools.partial(_gemm_bias_relu_kernel, relu6=relu6)
    out_p = pl.pallas_call(
        kernel,
        out_shape=jax.ShapeDtypeStruct((M_pad, N_pad), out_dtype),
        grid=grid,
        in_specs=[
            pl.BlockSpec((tm, tk), lambda i, j, k: (i, k)),
            pl.BlockSpec((tk, tn), lambda i, j, k: (k, j)),
            pl.BlockSpec((1, tn), lambda i, j, k: (0, j)),
        ],
        out_specs=pl.BlockSpec((tm, tn), lambda i, j, k: (i, j)),
        scratch_shapes=[pltpu.VMEM((tm, tn), jnp.float32)],
        compiler_params=pltpu.CompilerParams(
            dimension_semantics=("parallel", "parallel", "arbitrary"),
            vmem_limit_bytes=vmem_limit),
        cost_estimate=cost,
    )(patches_p, w_p, bias_p)

    out = out_p[:M, :Cout].reshape(N, Ho, Wo, Cout)
    return jnp.transpose(out, (0, 3, 1, 2))            # back to NCHW


def _reference(x_nchw, weight, gamma, beta, running_mean, running_var,
               stride, padding, dilation, relu6, eps=1e-5):
    y = jax.lax.conv_general_dilated(
        x_nchw.astype(jnp.float32), weight.astype(jnp.float32),
        window_strides=(stride, stride),
        padding=((padding, padding), (padding, padding)),
        rhs_dilation=(dilation, dilation),
        dimension_numbers=("NCHW", "OIHW", "NCHW"))
    inv_std = 1.0 / jnp.sqrt(running_var + eps)
    y = (y - running_mean[None, :, None, None]) * inv_std[None, :, None, None]
    y = y * gamma[None, :, None, None] + beta[None, :, None, None]
    y = jnp.maximum(y, 0.0)
    if relu6:
        y = jnp.minimum(y, 6.0)
    return y


def _run_case(key, N, Cin, H, W, Cout, KH, KW, stride, padding, dilation,
              relu6):
    kx, kw, kg, kb, km, kv = jax.random.split(key, 6)
    x = jax.random.normal(kx, (N, Cin, H, W), jnp.float32)
    weight = 0.1 * jax.random.normal(kw, (Cout, Cin, KH, KW), jnp.float32)
    gamma = 1.0 + 0.1 * jax.random.normal(kg, (Cout,), jnp.float32)
    beta = 0.1 * jax.random.normal(kb, (Cout,), jnp.float32)
    running_mean = 0.1 * jax.random.normal(km, (Cout,), jnp.float32)
    running_var = jnp.abs(jax.random.normal(kv, (Cout,), jnp.float32)) + 0.5

    out = conv_bn_relu(x, weight, gamma, beta, running_mean, running_var,
                       stride=stride, padding=padding, dilation=dilation,
                       relu6=relu6)
    out = jax.block_until_ready(out)

    ref = _reference(x, weight, gamma, beta, running_mean, running_var,
                     stride, padding, dilation, relu6)
    Ho = (H + 2 * padding - dilation * (KH - 1) - 1) // stride + 1
    Wo = (W + 2 * padding - dilation * (KW - 1) - 1) // stride + 1
    assert out.shape == (N, Cout, Ho, Wo), out.shape
    # bf16 MXU inputs with f32 accumulation -> loosened tolerance vs f32 ref.
    assert jnp.allclose(out.astype(jnp.float32), ref, atol=5e-2, rtol=5e-2), \
        float(jnp.max(jnp.abs(out.astype(jnp.float32) - ref)))


if __name__ == "__main__":
    key = jax.random.PRNGKey(0)
    k1, k2 = jax.random.split(key)

    # _ConvBNReLU(4, 8, 3, stride=1, padding=1, relu6=True)
    _run_case(k1, N=2, Cin=4, H=16, W=16, Cout=8, KH=3, KW=3,
              stride=1, padding=1, dilation=1, relu6=True)

    # _ConvBNReLU(4, 8, 1, stride=2, relu6=False)  — exercises the 1x1 path
    _run_case(k2, N=2, Cin=4, H=16, W=16, Cout=8, KH=1, KW=1,
              stride=2, padding=0, dilation=1, relu6=False)

    print("KERNEL_OK")
</pallas_src>

<mosaic_0001>
module attributes {stable_mosaic.version = 11 : i64} {
  func.func @_gemm_bias_relu_kernel(%arg0: i32, %arg1: i32, %arg2: i32, %arg3: memref<512x128xbf16, #tpu.memory_space<vmem>>, %arg4: memref<128x128xbf16, #tpu.memory_space<vmem>>, %arg5: memref<1x128xf32, #tpu.memory_space<vmem>>, %arg6: memref<512x128xf32, #tpu.memory_space<vmem>>, %arg7: memref<512x128xf32, #tpu.memory_space<vmem>>) attributes {dimension_semantics = [#tpu.dimension_semantics<parallel>, #tpu.dimension_semantics<parallel>, #tpu.dimension_semantics<arbitrary>], iteration_bounds = array<i64: 1, 1, 1>, scalar_prefetch = 0 : i64, scratch_operands = 1 : i64, tpu.core_type = #tpu.core_type<tc>, window_params = [{transform_indices = @transform_0, window_bounds = array<i64: 512, 128>}, {transform_indices = @transform_1, window_bounds = array<i64: 128, 128>}, {transform_indices = @transform_2, window_bounds = array<i64: 1, 128>}, {transform_indices = @transform_3, window_bounds = array<i64: 512, 128>}]} {
    %c0_i32 = arith.constant 0 : i32
    %0 = arith.cmpi eq, %arg2, %c0_i32 : i32
    %1 = arith.extui %0 : i1 to i32
    %c0_i32_0 = arith.constant 0 : i32
    %2 = arith.cmpi ne, %1, %c0_i32_0 : i32
    scf.if %2 {
      %cst_10 = arith.constant 0.000000e+00 : f32
      %12 = vector.broadcast %cst_10 : f32 to vector<512x128xf32>
      %c0_11 = arith.constant 0 : index
      %c0_12 = arith.constant 0 : index
      %13 = vector.load %arg7[%c0_11, %c0_12] : memref<512x128xf32, #tpu.memory_space<vmem>>, vector<512x128xf32>
      tpu.vector_store %arg7[%c0_11, %c0_12], %12 {strides = array<i32>} : memref<512x128xf32, #tpu.memory_space<vmem>>, vector<512x128xf32>,
    } else {
    }
    %c0 = arith.constant 0 : index
    %c0_1 = arith.constant 0 : index
    %3 = vector.load %arg7[%c0, %c0_1] : memref<512x128xf32, #tpu.memory_space<vmem>>, vector<512x128xf32>
    %c0_2 = arith.constant 0 : index
    %c0_3 = arith.constant 0 : index
    %4 = vector.load %arg3[%c0_2, %c0_3] : memref<512x128xbf16, #tpu.memory_space<vmem>>, vector<512x128xbf16>
    %c0_4 = arith.constant 0 : index
    %c0_5 = arith.constant 0 : index
    %5 = vector.load %arg4[%c0_4, %c0_5] : memref<128x128xbf16, #tpu.memory_space<vmem>>, vector<128x128xbf16>
    %cst = arith.constant dense<0.000000e+00> : vector<512x128xf32>
    %6 = tpu.matmul %4, %5, %cst {dimension_numbers = #tpu.dot_dimension_numbers<[1], [0], [0], [1], [0, 0, 1, 1], [], []>} : vector<512x128xbf16>, vector<128x128xbf16>, vector<512x128xf32> -> vector<512x128xf32>
    %7 = arith.addf %3, %6 : vector<512x128xf32>
    %c0_6 = arith.constant 0 : index
    %c0_7 = arith.constant 0 : index
    %8 = vector.load %arg7[%c0_6, %c0_7] : memref<512x128xf32, #tpu.memory_space<vmem>>, vector<512x128xf32>
    tpu.vector_store %arg7[%c0_6, %c0_7], %7 {strides = array<i32>} : memref<512x128xf32, #tpu.memory_space<vmem>>, vector<512x128xf32>,
    %c0_i32_8 = arith.constant 0 : i32
    %9 = arith.cmpi eq, %arg2, %c0_i32_8 : i32
    %10 = arith.extui %9 : i1 to i32
    %c0_i32_9 = arith.constant 0 : i32
    %11 = arith.cmpi ne, %10, %c0_i32_9 : i32
    scf.if %11 {
      %c0_10 = arith.constant 0 : index
      %c0_11 = arith.constant 0 : index
      %12 = vector.load %arg7[%c0_10, %c0_11] : memref<512x128xf32, #tpu.memory_space<vmem>>, vector<512x128xf32>
      %c0_12 = arith.constant 0 : index
      %c0_13 = arith.constant 0 : index
      %13 = vector.load %arg5[%c0_12, %c0_13] : memref<1x128xf32, #tpu.memory_space<vmem>>, vector<1x128xf32>
      %14 = vector.broadcast %13 : vector<1x128xf32> to vector<512x128xf32>
      %15 = arith.addf %12, %14 : vector<512x128xf32>
      %cst_14 = arith.constant 0.000000e+00 : f32
      %16 = vector.broadcast %cst_14 : f32 to vector<512x128xf32>
      %17 = arith.maximumf %15, %16 : vector<512x128xf32>
      %cst_15 = arith.constant 6.000000e+00 : f32
      %18 = vector.broadcast %cst_15 : f32 to vector<512x128xf32>
      %19 = arith.minimumf %17, %18 : vector<512x128xf32>
      %c0_16 = arith.constant 0 : index
      %c0_17 = arith.constant 0 : index
      %20 = vector.load %arg6[%c0_16, %c0_17] : memref<512x128xf32, #tpu.memory_space<vmem>>, vector<512x128xf32>
      tpu.vector_store %arg6[%c0_16, %c0_17], %19 {strides = array<i32>} : memref<512x128xf32, #tpu.memory_space<vmem>>, vector<512x128xf32>,
    } else {
    }
    return
  }
  func.func @transform_0(%arg0: i32, %arg1: i32, %arg2: i32) -> (i32, i32) {
    %c0_i32 = arith.constant 0 : i32
    return %arg0, %arg2 : i32, i32
  }
  func.func @transform_1(%arg0: i32, %arg1: i32, %arg2: i32) -> (i32, i32) {
    %c0_i32 = arith.constant 0 : i32
    return %arg2, %arg1 : i32, i32
  }
  func.func @transform_2(%arg0: i32, %arg1: i32, %arg2: i32) -> (i32, i32) {
    %c0_i32 = arith.constant 0 : i32
    %c0_i32_0 = arith.constant 0 : i32
    return %c0_i32, %arg1 : i32, i32
  }
  func.func @transform_3(%arg0: i32, %arg1: i32, %arg2: i32) -> (i32, i32) {
    %c0_i32 = arith.constant 0 : i32
    return %arg0, %arg1 : i32, i32
  }
}

</mosaic_0001>

<bundles_post_ra>
// kernel: tpu_custom_call.1
= control target key start
LH: loop header
LB: loop body
LE: loop exit
PB: predicated region body
PF: predicated region fallthrough
CT: control target
= control target key end

     0   :  { %8 = vsyncpa [#allocation4], 0  ;;  %s1689_s0 = inlined_call_operand.hbm [shape: bf16[512,128], index: 0, kind: input, shape index: {}]   ;;  %s1690_s1 = inlined_call_operand.hbm [shape: bf16[128,128], index: 1, kind: input, shape index: {}]   ;;  %s1691_s2 = inlined_call_operand.vmem [shape: f32[1,128], index: 2, kind: input, shape index: {}]   ;;  %s1692_s3 = inlined_call_operand.hbm [shape: f32[512,128], index: 3, kind: output, shape index: {}]  }
   0x1   :  { %9 = vsyncpa [#allocation7], 0 }
   0x2   :  { %10 = vsyncpa [#allocation5], 0  ;;  %s1557_s12 = smov [#allocation3]   ;;  %s1485_s16 = scalar_lea.hbm %s1689_s0, 4096 }
   0x3   :  { %s16_s13 = sshll.u32 %s1557_s12, 4  ;;  %p1486_p0 = scmp.ne.s32.totalorder %s1689_s0, %s1485_s16  ;;  %s17_s13 = int_to_ptr.vmem [resolvable:$true] %s16_s13 }
   0x4   :  { %p1489_p1 = scmp.lt.u32.totalorder %s1485_s16, %s1689_s0 }
   0x6   :  { %p1491_p2 = pnand %p1489_p1, %p1486_p0 }
   0x8   :  { %1494 = shalt.err (!%p1491_p2)
}
   0x9   :  { %s1495_s21 = scalar_lea.vmem %s17_s13, 4096  ;;  %p1500_p4 = scmp.lt.s32.totalorder %s17_s13, %s17_s13 }
   0xa   :  { %p1496_p3 = scmp.ne.s32.totalorder %s17_s13, %s1495_s21  ;;  %p1501_p5 = scmp.lt.s32.totalorder %s1495_s21, %s1495_s21 }
   0xc   :  { %p1502_p6 = por %p1501_p5, %p1500_p4 }
   0xe   :  { %p1503_p7 = pnand %p1502_p6, %p1496_p3 }
  0x10   :  { %1506 = shalt.err (!%p1503_p7)
}
  0x11   :  { %s1558_s22 = smov 64   ;;  %s1559_s23 = smov 4  }
  0x12   :  { %22 = dma.hbm_to_vmem [thread:$0]  %s1689_s0, 4096, %s17_s13, [#allocation4], %s1558_s22, %s1558_s22, %s1559_s23  }
  0x13   :  { %s1560_s26 = smov [#allocation6]   ;;  %s1507_s30 = scalar_lea.hbm %s1690_s1, 1024 }
  0x14   :  { %s28_s27 = sshll.u32 %s1560_s26, 4  ;;  %p1508_p8 = scmp.ne.s32.totalorder %s1690_s1, %s1507_s30  ;;  %s29_s27 = int_to_ptr.vmem [resolvable:$true] %s28_s27 }
  0x15   :  { %p1511_p9 = scmp.lt.u32.totalorder %s1507_s30, %s1690_s1 }
  0x17   :  { %p1513_p10 = pnand %p1511_p9, %p1508_p8 }
  0x19   :  { %1516 = shalt.err (!%p1513_p10)
}
  0x1a   :  { %s1517_s8 = scalar_lea.vmem %s29_s27, 1024  ;;  %p1522_p12 = scmp.lt.s32.totalorder %s29_s27, %s29_s27 }
  0x1b   :  { %p1518_p11 = scmp.ne.s32.totalorder %s29_s27, %s1517_s8  ;;  %p1523_p13 = scmp.lt.s32.totalorder %s1517_s8, %s1517_s8 }
  0x1d   :  { %p1524_p0 = por %p1523_p13, %p1522_p12 }
  0x1f   :  { %p1525_p1 = pnand %p1524_p0, %p1518_p11 }
  0x21   :  { %1528 = shalt.err (!%p1525_p1)
}
  0x22   :  { %34 = dma.hbm_to_vmem [thread:$0]  %s1690_s1, 1024, %s29_s27, [#allocation7], %s1558_s22, %s1558_s22, %s1559_s23  }
  0x23   :  { %1551 = dma.done.wait [#allocation4], 4096  }
  0x24   :  { %1552 = vsyncadd [#allocation4], 4294963200 }
  0x25   :  { %1553 = dma.done.wait [#allocation7], 1024  }
  0x26   :  { %1554 = vsyncadd [#allocation7], 4294966272  ;;  %v1445_v0 = vld [vmem:[#allocation6] sm:$0xff]   ;;  %v1446_v1 = vld [vmem:[#allocation6 + $0x8] sm:$0xff]  }
  0x27   :  { %1342 = vmatprep.subr.bf16.mxu0 %v1445_v0  ;;  %1422 = vmatprep.subr.bf16.mxu1 %v1445_v0  ;;  %v1447_v2 = vld [vmem:[#allocation6 + $0x10] sm:$0xff]   ;;  %v1448_v3 = vld [vmem:[#allocation6 + $0x18] sm:$0xff]   ;;  %v1453_v4 = vld [vmem:[#allocation3] sm:$0xff]  }
  0x28   :  { %1343 = vmatpush3.bf16.msra.mxu0 %v1445_v0  ;;  %1430 = vmatpush3.bf16.msra.mxu1 %v1445_v0  ;;  %v1454_v5 = vld [vmem:[#allocation3 + $0x80] sm:$0xff]   ;;  %v1450_v7 = vld [vmem:[#allocation6 + $0x28] sm:$0xff]   ;;  %v1451_v8 = vld [vmem:[#allocation6 + $0x30] sm:$0xff]  }
  0x29   :  { %1344 = vmatprep.subr.bf16.mxu0 %v1446_v1  ;;  %1423 = vmatprep.subr.bf16.mxu1 %v1446_v1  ;;  %v1449_v6 = vld [vmem:[#allocation6 + $0x20] sm:$0xff]   ;;  %v1452_v9 = vld [vmem:[#allocation6 + $0x38] sm:$0xff]   ;;  %v1455_v10 = vld [vmem:[#allocation3 + $0x8] sm:$0xff]  }
  0x2a   :  { %1358 = vmatprep.mubr.bf16.mxu0 %v1453_v4  ;;  %1390 = vmatprep.mubr.bf16.mxu1 %v1454_v5  ;;  %v1456_v11 = vld [vmem:[#allocation3 + $0x88] sm:$0xff]   ;;  %v1457_v12 = vld [vmem:[#allocation3 + $0x10] sm:$0xff]   ;;  %v1459_v14 = vld [vmem:[#allocation3 + $0x18] sm:$0xff]  }
  0x2b   :  { %v1458_v13 = vld [vmem:[#allocation3 + $0x90] sm:$0xff]   ;;  %v1460_v15 = vld [vmem:[#allocation3 + $0x98] sm:$0xff]   ;;  %v1461_v16 = vld [vmem:[#allocation3 + $0x20] sm:$0xff]  }
  0x2c   :  { %1345 = vmatpush3.bf16.msra.mxu0 %v1446_v1  ;;  %1431 = vmatpush3.bf16.msra.mxu1 %v1446_v1  ;;  %v1462_v17 = vld [vmem:[#allocation3 + $0xa0] sm:$0xff]   ;;  %v1463_v18 = vld [vmem:[#allocation3 + $0x28] sm:$0xff]   ;;  %v1465_v20 = vld [vmem:[#allocation3 + $0x30] sm:$0xff]  }
  0x2d   :  { %1346 = vmatprep.subr.bf16.mxu0 %v1447_v2  ;;  %1424 = vmatprep.subr.bf16.mxu1 %v1447_v2  ;;  %v1464_v19 = vld [vmem:[#allocation3 + $0xa8] sm:$0xff]   ;;  %v1466_v21 = vld [vmem:[#allocation3 + $0xb0] sm:$0xff]   ;;  %v1467_v22 = vld [vmem:[#allocation3 + $0x38] sm:$0xff]  }
  0x2e   :  { %v1468_v23 = vld [vmem:[#allocation3 + $0xb8] sm:$0xff]   ;;  %v1469_v24 = vld [vmem:[#allocation3 + $0x40] sm:$0xff]   ;;  %v1471_v26 = vld [vmem:[#allocation3 + $0x48] sm:$0xff]  }
  0x2f   :  { %v1470_v25 = vld [vmem:[#allocation3 + $0xc0] sm:$0xff]   ;;  %v1472_v27 = vld [vmem:[#allocation3 + $0xc8] sm:$0xff]   ;;  %v1473_v28 = vld [vmem:[#allocation3 + $0x50] sm:$0xff]  }
  0x30   :  { %1347 = vmatpush3.bf16.msra.mxu0 %v1447_v2  ;;  %1432 = vmatpush3.bf16.msra.mxu1 %v1447_v2  ;;  %v1474_v29 = vld [vmem:[#allocation3 + $0xd0] sm:$0xff]   ;;  %v1475_v30 = vld [vmem:[#allocation3 + $0x58] sm:$0xff]   ;;  %v1477_v32 = vld [vmem:[#allocation3 + $0x60] sm:$0xff]  }
  0x31   :  { %1348 = vmatprep.subr.bf16.mxu0 %v1448_v3  ;;  %1425 = vmatprep.subr.bf16.mxu1 %v1448_v3  ;;  %v1476_v31 = vld [vmem:[#allocation3 + $0xd8] sm:$0xff]   ;;  %v1478_v33 = vld [vmem:[#allocation3 + $0xe0] sm:$0xff]   ;;  %v1479_v34 = vld [vmem:[#allocation3 + $0x68] sm:$0xff]  }
  0x32   :  { %v1480_v35 = vld [vmem:[#allocation3 + $0xe8] sm:$0xff]   ;;  %v1481_v36 = vld [vmem:[#allocation3 + $0x70] sm:$0xff]   ;;  %v1483_v38 = vld [vmem:[#allocation3 + $0x78] sm:$0xff]  }
  0x33   :  { %v1482_v37 = vld [vmem:[#allocation3 + $0xf0] sm:$0xff]   ;;  %v1484_v39 = vld [vmem:[#allocation3 + $0xf8] sm:$0xff]   ;;  %v1611_v40 = vld [vmem:[%s1691_s2] ss:$0 sm:$0xff]  ;;  %s1561_s2 = smov [#allocation8]  }
  0x34   :  { %1349 = vmatpush3.bf16.msra.mxu0 %v1448_v3  ;;  %1433 = vmatpush3.bf16.msra.mxu1 %v1448_v3  ;;  %s1248_s11 = sshll.u32 %s1561_s2, 4  ;;  %s1249_s11 = int_to_ptr.vmem [resolvable:$true] %s1248_s11 }
  0x35   :  { %1350 = vmatprep.subr.bf16.mxu0 %v1449_v6  ;;  %1426 = vmatprep.subr.bf16.mxu1 %v1449_v6  ;;  %s1529_s12 = scalar_lea.vmem %s1249_s11, 8192  ;;  %p1534_p3 = scmp.lt.s32.totalorder %s1249_s11, %s1249_s11 }
  0x36   :  { %p1530_p2 = scmp.ne.s32.totalorder %s1249_s11, %s1529_s12  ;;  %p1535_p4 = scmp.lt.s32.totalorder %s1529_s12, %s1529_s12 }
  0x38   :  { %1351 = vmatpush3.bf16.msra.mxu0 %v1449_v6  ;;  %1434 = vmatpush3.bf16.msra.mxu1 %v1449_v6  ;;  %p1536_p5 = por %p1535_p4, %p1534_p3 }
  0x39   :  { %1352 = vmatprep.subr.bf16.mxu0 %v1450_v7  ;;  %1427 = vmatprep.subr.bf16.mxu1 %v1450_v7 }
  0x3a   :  { %p1537_p6 = pnand %p1536_p5, %p1530_p2 }
  0x3c   :  { %1353 = vmatpush3.bf16.msra.mxu0 %v1450_v7  ;;  %1435 = vmatpush3.bf16.msra.mxu1 %v1450_v7 }
  0x3d   :  { %1354 = vmatprep.subr.bf16.mxu0 %v1451_v8  ;;  %1428 = vmatprep.subr.bf16.mxu1 %v1451_v8 }
  0x40   :  { %1355 = vmatpush3.bf16.msra.mxu0 %v1451_v8  ;;  %1436 = vmatpush3.bf16.msra.mxu1 %v1451_v8 }
  0x41   :  { %1356 = vmatprep.subr.bf16.mxu0 %v1452_v9  ;;  %1429 = vmatprep.subr.bf16.mxu1 %v1452_v9 }
  0x44   :  { %1357 = vmatpush3.bf16.msra.mxu0 %v1452_v9  ;;  %1437 = vmatpush3.bf16.msra.mxu1 %v1452_v9 }
  0x47   :  { %1359 = vmatmul.mubr.bf16.vlgmr.msra.gmra.mrb[0].mxu0 %v1455_v10  ;;  %1391 = vmatmul.mubr.bf16.vlgmr.msra.gmra.mrb[0].mxu1 %v1456_v11 }
  0x48   :  { %1362 = vmatprep.mubr.bf16.mxu0 %v1457_v12  ;;  %1394 = vmatprep.mubr.bf16.mxu1 %v1458_v13 }
  0x4f   :  { %1363 = vmatmul.mubr.bf16.gmra.mrb[4].mxu0 %v1459_v14  ;;  %1395 = vmatmul.mubr.bf16.gmra.mrb[4].mxu1 %v1460_v15 }
  0x50   :  { %1366 = vmatprep.mubr.bf16.mxu0 %v1461_v16  ;;  %1398 = vmatprep.mubr.bf16.mxu1 %v1462_v17 }
  0x57   :  { %1367 = vmatmul.mubr.bf16.gmra.mrb[8].mxu0 %v1463_v18  ;;  %1399 = vmatmul.mubr.bf16.gmra.mrb[8].mxu1 %v1464_v19 }
  0x58   :  { %1370 = vmatprep.mubr.bf16.mxu0 %v1465_v20  ;;  %1402 = vmatprep.mubr.bf16.mxu1 %v1466_v21 }
  0x5f   :  { %1371 = vmatmul.mubr.bf16.gmra.mrb[12].mxu0 %v1467_v22  ;;  %1403 = vmatmul.mubr.bf16.gmra.mrb[12].mxu1 %v1468_v23 }
  0x60   :  { %1374 = vmatprep.mubr.bf16.mxu0 %v1469_v24  ;;  %1406 = vmatprep.mubr.bf16.mxu1 %v1470_v25 }
  0x67   :  { %1375 = vmatmul.mubr.bf16.gmra.mrb[16].mxu0 %v1471_v26  ;;  %1407 = vmatmul.mubr.bf16.gmra.mrb[16].mxu1 %v1472_v27 }
  0x68   :  { %1378 = vmatprep.mubr.bf16.mxu0 %v1473_v28  ;;  %1410 = vmatprep.mubr.bf16.mxu1 %v1474_v29 }
  0x6f   :  { %1379 = vmatmul.mubr.bf16.gmra.mrb[20].mxu0 %v1475_v30  ;;  %1411 = vmatmul.mubr.bf16.gmra.mrb[20].mxu1 %v1476_v31 }
  0x70   :  { %1382 = vmatprep.mubr.bf16.mxu0 %v1477_v32  ;;  %1414 = vmatprep.mubr.bf16.mxu1 %v1478_v33 }
  0x77   :  { %1383 = vmatmul.mubr.bf16.gmra.mrb[24].mxu0 %v1479_v34  ;;  %1415 = vmatmul.mubr.bf16.gmra.mrb[24].mxu1 %v1480_v35 }
  0x78   :  { %1386 = vmatprep.mubr.bf16.mxu0 %v1481_v36  ;;  %1418 = vmatprep.mubr.bf16.mxu1 %v1482_v37 }
  0x7f   :  { %1387 = vmatmul.mubr.bf16.gmra.mrb[28].mxu0 %v1483_v38  ;;  %1419 = vmatmul.mubr.bf16.gmra.mrb[28].mxu1 %v1484_v39 }
 0x11a   :  { %v1360_v41 = vpop.f32.mrb[0].mxu0  ;;  %v1392_v42 = vpop.f32.mrb[0].mxu1 }
 0x11b   :  { %v989_v43 = vadd.f32 %v1360_v41, %v1611_v40  ;;  %v1021_v44 = vadd.f32 %v1392_v42, %v1611_v40  ;;  %v530_v45 = vpop.f32.mrb[1].mxu0  ;;  %v658_v46 = vpop.f32.mrb[1].mxu1 }
 0x11c   :  { %v987_v47 = vadd.f32 %v1611_v40, %v530_v45  ;;  %v1019_v48 = vadd.f32 %v1611_v40, %v658_v46  ;;  %v1361_v49 = vpop.f32.mrb[2].mxu0  ;;  %v1393_v50 = vpop.f32.mrb[2].mxu1 }
 0x11d   :  { %v1053_v51 = vmax.f32 %v989_v43, 0.0  ;;  %v1085_v52 = vmax.f32 %v1021_v44, 0.0  ;;  %v990_v53 = vadd.f32 %v1361_v49, %v1611_v40  ;;  %v1022_v54 = vadd.f32 %v1393_v50, %v1611_v40  ;;  %v533_v55 = vpop.f32.mrb[3].mxu0  ;;  %v661_v56 = vpop.f32.mrb[3].mxu1 }
 0x11e   :  { %v1051_v57 = vmax.f32 %v987_v47, 0.0  ;;  %v1083_v58 = vmax.f32 %v1019_v48, 0.0  ;;  %v988_v59 = vadd.f32 %v1611_v40, %v533_v55  ;;  %v1020_v60 = vadd.f32 %v1611_v40, %v661_v56 }
 0x11f   :  { %v1117_v61 = vmin.f32 %v1053_v51, 6.0  ;;  %v1149_v62 = vmin.f32 %v1085_v52, 6.0  ;;  %v1054_v63 = vmax.f32 %v990_v53, 0.0  ;;  %v1086_v0 = vmax.f32 %v1022_v54, 0.0 }
 0x120   :  { %v1115_v1 = vmin.f32 %v1051_v57, 6.0  ;;  %v1147_v2 = vmin.f32 %v1083_v58, 6.0  ;;  %v1052_v3 = vmax.f32 %v988_v59, 0.0  ;;  %v1084_v4 = vmax.f32 %v1020_v60, 0.0 }
 0x121   :  { %1181 = vst [vmem:[#allocation8 + $0x10] sm:$0xff] %v1117_v61  ;;  %1213 = vst [vmem:[#allocation8 + $0x110] sm:$0xff] %v1149_v62  ;;  %v1118_v5 = vmin.f32 %v1054_v63, 6.0  ;;  %v1150_v6 = vmin.f32 %v1086_v0, 6.0 }
 0x122   :  { %1179 = vst [vmem:[#allocation8] sm:$0xff] %v1115_v1  ;;  %1211 = vst [vmem:[#allocation8 + $0x100] sm:$0xff] %v1147_v2  ;;  %v1116_v7 = vmin.f32 %v1052_v3, 6.0  ;;  %v1148_v8 = vmin.f32 %v1084_v4, 6.0  ;;  %v1364_v9 = vpop.f32.mrb[4].mxu0  ;;  %v1396_v10 = vpop.f32.mrb[4].mxu1 }
 0x123   :  { %1182 = vst [vmem:[#allocation8 + $0x18] sm:$0xff] %v1118_v5  ;;  %1214 = vst [vmem:[#allocation8 + $0x118] sm:$0xff] %v1150_v6  ;;  %v993_v11 = vadd.f32 %v1364_v9, %v1611_v40  ;;  %v1025_v12 = vadd.f32 %v1396_v10, %v1611_v40  ;;  %v546_v13 = vpop.f32.mrb[5].mxu0  ;;  %v674_v14 = vpop.f32.mrb[5].mxu1 }
 0x124   :  { %1180 = vst [vmem:[#allocation8 + $0x8] sm:$0xff] %v1116_v7  ;;  %1212 = vst [vmem:[#allocation8 + $0x108] sm:$0xff] %v1148_v8  ;;  %v991_v15 = vadd.f32 %v1611_v40, %v546_v13  ;;  %v1023_v16 = vadd.f32 %v1611_v40, %v674_v14  ;;  %v1365_v17 = vpop.f32.mrb[6].mxu0  ;;  %v1397_v18 = vpop.f32.mrb[6].mxu1 }
 0x125   :  { %v1057_v19 = vmax.f32 %v993_v11, 0.0  ;;  %v1089_v20 = vmax.f32 %v1025_v12, 0.0  ;;  %v994_v21 = vadd.f32 %v1365_v17, %v1611_v40  ;;  %v1026_v22 = vadd.f32 %v1397_v18, %v1611_v40  ;;  %v549_v23 = vpop.f32.mrb[7].mxu0  ;;  %v677_v24 = vpop.f32.mrb[7].mxu1 }
 0x126   :  { %v1055_v25 = vmax.f32 %v991_v15, 0.0  ;;  %v1087_v26 = vmax.f32 %v1023_v16, 0.0  ;;  %v992_v27 = vadd.f32 %v1611_v40, %v549_v23  ;;  %v1024_v28 = vadd.f32 %v1611_v40, %v677_v24 }
 0x127   :  { %v1121_v29 = vmin.f32 %v1057_v19, 6.0  ;;  %v1153_v30 = vmin.f32 %v1089_v20, 6.0  ;;  %v1058_v31 = vmax.f32 %v994_v21, 0.0  ;;  %v1090_v32 = vmax.f32 %v1026_v22, 0.0 }
 0x128   :  { %v1119_v33 = vmin.f32 %v1055_v25, 6.0  ;;  %v1151_v34 = vmin.f32 %v1087_v26, 6.0  ;;  %v1056_v35 = vmax.f32 %v992_v27, 0.0  ;;  %v1088_v36 = vmax.f32 %v1024_v28, 0.0 }
 0x129   :  { %1185 = vst [vmem:[#allocation8 + $0x30] sm:$0xff] %v1121_v29  ;;  %1217 = vst [vmem:[#allocation8 + $0x130] sm:$0xff] %v1153_v30  ;;  %v1122_v37 = vmin.f32 %v1058_v31, 6.0  ;;  %v1154_v38 = vmin.f32 %v1090_v32, 6.0 }
 0x12a   :  { %1183 = vst [vmem:[#allocation8 + $0x20] sm:$0xff] %v1119_v33  ;;  %1215 = vst [vmem:[#allocation8 + $0x120] sm:$0xff] %v1151_v34  ;;  %v1120_v39 = vmin.f32 %v1056_v35, 6.0  ;;  %v1152_v41 = vmin.f32 %v1088_v36, 6.0  ;;  %v1368_v42 = vpop.f32.mrb[8].mxu0  ;;  %v1400_v43 = vpop.f32.mrb[8].mxu1 }
 0x12b   :  { %1186 = vst [vmem:[#allocation8 + $0x38] sm:$0xff] %v1122_v37  ;;  %1218 = vst [vmem:[#allocation8 + $0x138] sm:$0xff] %v1154_v38  ;;  %v997_v44 = vadd.f32 %v1368_v42, %v1611_v40  ;;  %v1029_v45 = vadd.f32 %v1400_v43, %v1611_v40  ;;  %v562_v46 = vpop.f32.mrb[9].mxu0  ;;  %v690_v47 = vpop.f32.mrb[9].mxu1 }
 0x12c   :  { %1184 = vst [vmem:[#allocation8 + $0x28] sm:$0xff] %v1120_v39  ;;  %1216 = vst [vmem:[#allocation8 + $0x128] sm:$0xff] %v1152_v41  ;;  %v995_v48 = vadd.f32 %v1611_v40, %v562_v46  ;;  %v1027_v49 = vadd.f32 %v1611_v40, %v690_v47  ;;  %v1369_v50 = vpop.f32.mrb[10].mxu0  ;;  %v1401_v51 = vpop.f32.mrb[10].mxu1 }
 0x12d   :  { %v1061_v52 = vmax.f32 %v997_v44, 0.0  ;;  %v1093_v53 = vmax.f32 %v1029_v45, 0.0  ;;  %v998_v54 = vadd.f32 %v1369_v50, %v1611_v40  ;;  %v1030_v55 = vadd.f32 %v1401_v51, %v1611_v40  ;;  %v565_v56 = vpop.f32.mrb[11].mxu0  ;;  %v693_v57 = vpop.f32.mrb[11].mxu1 }
 0x12e   :  { %v1059_v58 = vmax.f32 %v995_v48, 0.0  ;;  %v1091_v59 = vmax.f32 %v1027_v49, 0.0  ;;  %v996_v60 = vadd.f32 %v1611_v40, %v565_v56  ;;  %v1028_v61 = vadd.f32 %v1611_v40, %v693_v57 }
 0x12f   :  { %v1125_v62 = vmin.f32 %v1061_v52, 6.0  ;;  %v1157_v63 = vmin.f32 %v1093_v53, 6.0  ;;  %v1062_v0 = vmax.f32 %v998_v54, 0.0  ;;  %v1094_v1 = vmax.f32 %v1030_v55, 0.0 }
 0x130   :  { %v1123_v2 = vmin.f32 %v1059_v58, 6.0  ;;  %v1155_v3 = vmin.f32 %v1091_v59, 6.0  ;;  %v1060_v4 = vmax.f32 %v996_v60, 0.0  ;;  %v1092_v5 = vmax.f32 %v1028_v61, 0.0 }
 0x131   :  { %1189 = vst [vmem:[#allocation8 + $0x50] sm:$0xff] %v1125_v62  ;;  %1221 = vst [vmem:[#allocation8 + $0x150] sm:$0xff] %v1157_v63  ;;  %v1126_v6 = vmin.f32 %v1062_v0, 6.0  ;;  %v1158_v7 = vmin.f32 %v1094_v1, 6.0 }
 0x132   :  { %1187 = vst [vmem:[#allocation8 + $0x40] sm:$0xff] %v1123_v2  ;;  %1219 = vst [vmem:[#allocation8 + $0x140] sm:$0xff] %v1155_v3  ;;  %v1124_v8 = vmin.f32 %v1060_v4, 6.0  ;;  %v1156_v9 = vmin.f32 %v1092_v5, 6.0  ;;  %v1372_v10 = vpop.f32.mrb[12].mxu0  ;;  %v1404_v11 = vpop.f32.mrb[12].mxu1 }
 0x133   :  { %1190 = vst [vmem:[#allocation8 + $0x58] sm:$0xff] %v1126_v6  ;;  %1222 = vst [vmem:[#allocation8 + $0x158] sm:$0xff] %v1158_v7  ;;  %v1001_v12 = vadd.f32 %v1372_v10, %v1611_v40  ;;  %v1033_v13 = vadd.f32 %v1404_v11, %v1611_v40  ;;  %v578_v14 = vpop.f32.mrb[13].mxu0  ;;  %v706_v15 = vpop.f32.mrb[13].mxu1 }
 0x134   :  { %1188 = vst [vmem:[#allocation8 + $0x48] sm:$0xff] %v1124_v8  ;;  %1220 = vst [vmem:[#allocation8 + $0x148] sm:$0xff] %v1156_v9  ;;  %v999_v16 = vadd.f32 %v1611_v40, %v578_v14  ;;  %v1031_v17 = vadd.f32 %v1611_v40, %v706_v15  ;;  %v1373_v18 = vpop.f32.mrb[14].mxu0  ;;  %v1405_v19 = vpop.f32.mrb[14].mxu1 }
 0x135   :  { %v1065_v20 = vmax.f32 %v1001_v12, 0.0  ;;  %v1097_v21 = vmax.f32 %v1033_v13, 0.0  ;;  %v1002_v22 = vadd.f32 %v1373_v18, %v1611_v40  ;;  %v1034_v23 = vadd.f32 %v1405_v19, %v1611_v40  ;;  %v581_v24 = vpop.f32.mrb[15].mxu0  ;;  %v709_v25 = vpop.f32.mrb[15].mxu1 }
 0x136   :  { %v1063_v26 = vmax.f32 %v999_v16, 0.0  ;;  %v1095_v27 = vmax.f32 %v1031_v17, 0.0  ;;  %v1000_v28 = vadd.f32 %v1611_v40, %v581_v24  ;;  %v1032_v29 = vadd.f32 %v1611_v40, %v709_v25 }
 0x137   :  { %v1129_v30 = vmin.f32 %v1065_v20, 6.0  ;;  %v1161_v31 = vmin.f32 %v1097_v21, 6.0  ;;  %v1066_v32 = vmax.f32 %v1002_v22, 0.0  ;;  %v1098_v33 = vmax.f32 %v1034_v23, 0.0 }
 0x138   :  { %v1127_v34 = vmin.f32 %v1063_v26, 6.0  ;;  %v1159_v35 = vmin.f32 %v1095_v27, 6.0  ;;  %v1064_v36 = vmax.f32 %v1000_v28, 0.0  ;;  %v1096_v37 = vmax.f32 %v1032_v29, 0.0 }
 0x139   :  { %1193 = vst [vmem:[#allocation8 + $0x70] sm:$0xff] %v1129_v30  ;;  %1225 = vst [vmem:[#allocation8 + $0x170] sm:$0xff] %v1161_v31  ;;  %v1130_v38 = vmin.f32 %v1066_v32, 6.0  ;;  %v1162_v39 = vmin.f32 %v1098_v33, 6.0 }
 0x13a   :  { %1191 = vst [vmem:[#allocation8 + $0x60] sm:$0xff] %v1127_v34  ;;  %1223 = vst [vmem:[#allocation8 + $0x160] sm:$0xff] %v1159_v35  ;;  %v1128_v41 = vmin.f32 %v1064_v36, 6.0  ;;  %v1160_v42 = vmin.f32 %v1096_v37, 6.0  ;;  %v1376_v43 = vpop.f32.mrb[16].mxu0  ;;  %v1408_v44 = vpop.f32.mrb[16].mxu1 }
 0x13b   :  { %1194 = vst [vmem:[#allocation8 + $0x78] sm:$0xff] %v1130_v38  ;;  %1226 = vst [vmem:[#allocation8 + $0x178] sm:$0xff] %v1162_v39  ;;  %v1005_v45 = vadd.f32 %v1376_v43, %v1611_v40  ;;  %v1037_v46 = vadd.f32 %v1408_v44, %v1611_v40  ;;  %v594_v47 = vpop.f32.mrb[17].mxu0  ;;  %v722_v48 = vpop.f32.mrb[17].mxu1 }
 0x13c   :  { %1192 = vst [vmem:[#allocation8 + $0x68] sm:$0xff] %v1128_v41  ;;  %1224 = vst [vmem:[#allocation8 + $0x168] sm:$0xff] %v1160_v42  ;;  %v1003_v49 = vadd.f32 %v1611_v40, %v594_v47  ;;  %v1035_v50 = vadd.f32 %v1611_v40, %v722_v48  ;;  %v1377_v51 = vpop.f32.mrb[18].mxu0  ;;  %v1409_v52 = vpop.f32.mrb[18].mxu1 }
 0x13d   :  { %v1069_v53 = vmax.f32 %v1005_v45, 0.0  ;;  %v1101_v54 = vmax.f32 %v1037_v46, 0.0  ;;  %v1006_v55 = vadd.f32 %v1377_v51, %v1611_v40  ;;  %v1038_v56 = vadd.f32 %v1409_v52, %v1611_v40  ;;  %v597_v57 = vpop.f32.mrb[19].mxu0  ;;  %v725_v58 = vpop.f32.mrb[19].mxu1 }
 0x13e   :  { %v1067_v59 = vmax.f32 %v1003_v49, 0.0  ;;  %v1099_v60 = vmax.f32 %v1035_v50, 0.0  ;;  %v1004_v61 = vadd.f32 %v1611_v40, %v597_v57  ;;  %v1036_v62 = vadd.f32 %v1611_v40, %v725_v58 }
 0x13f   :  { %v1133_v63 = vmin.f32 %v1069_v53, 6.0  ;;  %v1165_v0 = vmin.f32 %v1101_v54, 6.0  ;;  %v1070_v1 = vmax.f32 %v1006_v55, 0.0  ;;  %v1102_v2 = vmax.f32 %v1038_v56, 0.0 }
 0x140   :  { %v1131_v3 = vmin.f32 %v1067_v59, 6.0  ;;  %v1163_v4 = vmin.f32 %v1099_v60, 6.0  ;;  %v1068_v5 = vmax.f32 %v1004_v61, 0.0  ;;  %v1100_v6 = vmax.f32 %v1036_v62, 0.0 }
 0x141   :  { %1197 = vst [vmem:[#allocation8 + $0x90] sm:$0xff] %v1133_v63  ;;  %1229 = vst [vmem:[#allocation8 + $0x190] sm:$0xff] %v1165_v0  ;;  %v1134_v7 = vmin.f32 %v1070_v1, 6.0  ;;  %v1166_v8 = vmin.f32 %v1102_v2, 6.0 }
 0x142   :  { %1195 = vst [vmem:[#allocation8 + $0x80] sm:$0xff] %v1131_v3  ;;  %1227 = vst [vmem:[#allocation8 + $0x180] sm:$0xff] %v1163_v4  ;;  %v1132_v9 = vmin.f32 %v1068_v5, 6.0  ;;  %v1164_v10 = vmin.f32 %v1100_v6, 6.0  ;;  %v1380_v11 = vpop.f32.mrb[20].mxu0  ;;  %v1412_v12 = vpop.f32.mrb[20].mxu1 }
 0x143   :  { %1198 = vst [vmem:[#allocation8 + $0x98] sm:$0xff] %v1134_v7  ;;  %1230 = vst [vmem:[#allocation8 + $0x198] sm:$0xff] %v1166_v8  ;;  %v1009_v13 = vadd.f32 %v1380_v11, %v1611_v40  ;;  %v1041_v14 = vadd.f32 %v1412_v12, %v1611_v40  ;;  %v610_v15 = vpop.f32.mrb[21].mxu0  ;;  %v738_v16 = vpop.f32.mrb[21].mxu1 }
 0x144   :  { %1196 = vst [vmem:[#allocation8 + $0x88] sm:$0xff] %v1132_v9  ;;  %1228 = vst [vmem:[#allocation8 + $0x188] sm:$0xff] %v1164_v10  ;;  %v1007_v17 = vadd.f32 %v1611_v40, %v610_v15  ;;  %v1039_v18 = vadd.f32 %v1611_v40, %v738_v16  ;;  %v1381_v19 = vpop.f32.mrb[22].mxu0  ;;  %v1413_v20 = vpop.f32.mrb[22].mxu1 }
 0x145   :  { %v1073_v21 = vmax.f32 %v1009_v13, 0.0  ;;  %v1105_v22 = vmax.f32 %v1041_v14, 0.0  ;;  %v1010_v23 = vadd.f32 %v1381_v19, %v1611_v40  ;;  %v1042_v24 = vadd.f32 %v1413_v20, %v1611_v40  ;;  %v613_v25 = vpop.f32.mrb[23].mxu0  ;;  %v741_v26 = vpop.f32.mrb[23].mxu1 }
 0x146   :  { %v1071_v27 = vmax.f32 %v1007_v17, 0.0  ;;  %v1103_v28 = vmax.f32 %v1039_v18, 0.0  ;;  %v1008_v29 = vadd.f32 %v1611_v40, %v613_v25  ;;  %v1040_v30 = vadd.f32 %v1611_v40, %v741_v26 }
 0x147   :  { %v1137_v31 = vmin.f32 %v1073_v21, 6.0  ;;  %v1169_v32 = vmin.f32 %v1105_v22, 6.0  ;;  %v1074_v33 = vmax.f32 %v1010_v23, 0.0  ;;  %v1106_v34 = vmax.f32 %v1042_v24, 0.0 }
 0x148   :  { %v1135_v35 = vmin.f32 %v1071_v27, 6.0  ;;  %v1167_v36 = vmin.f32 %v1103_v28, 6.0  ;;  %v1072_v37 = vmax.f32 %v1008_v29, 0.0  ;;  %v1104_v38 = vmax.f32 %v1040_v30, 0.0 }
 0x149   :  { %1201 = vst [vmem:[#allocation8 + $0xb0] sm:$0xff] %v1137_v31  ;;  %1233 = vst [vmem:[#allocation8 + $0x1b0] sm:$0xff] %v1169_v32  ;;  %v1138_v39 = vmin.f32 %v1074_v33, 6.0  ;;  %v1170_v41 = vmin.f32 %v1106_v34, 6.0 }
 0x14a   :  { %1199 = vst [vmem:[#allocation8 + $0xa0] sm:$0xff] %v1135_v35  ;;  %1231 = vst [vmem:[#allocation8 + $0x1a0] sm:$0xff] %v1167_v36  ;;  %v1136_v42 = vmin.f32 %v1072_v37, 6.0  ;;  %v1168_v43 = vmin.f32 %v1104_v38, 6.0  ;;  %v1384_v44 = vpop.f32.mrb[24].mxu0  ;;  %v1416_v45 = vpop.f32.mrb[24].mxu1 }
 0x14b   :  { %1202 = vst [vmem:[#allocation8 + $0xb8] sm:$0xff] %v1138_v39  ;;  %1234 = vst [vmem:[#allocation8 + $0x1b8] sm:$0xff] %v1170_v41  ;;  %v1013_v46 = vadd.f32 %v1384_v44, %v1611_v40  ;;  %v1045_v47 = vadd.f32 %v1416_v45, %v1611_v40  ;;  %v626_v48 = vpop.f32.mrb[25].mxu0  ;;  %v754_v49 = vpop.f32.mrb[25].mxu1 }
 0x14c   :  { %1200 = vst [vmem:[#allocation8 + $0xa8] sm:$0xff] %v1136_v42  ;;  %1232 = vst [vmem:[#allocation8 + $0x1a8] sm:$0xff] %v1168_v43  ;;  %v1011_v50 = vadd.f32 %v1611_v40, %v626_v48  ;;  %v1043_v51 = vadd.f32 %v1611_v40, %v754_v49  ;;  %v1385_v52 = vpop.f32.mrb[26].mxu0  ;;  %v1417_v53 = vpop.f32.mrb[26].mxu1 }
 0x14d   :  { %v1077_v54 = vmax.f32 %v1013_v46, 0.0  ;;  %v1109_v55 = vmax.f32 %v1045_v47, 0.0  ;;  %v1014_v56 = vadd.f32 %v1385_v52, %v1611_v40  ;;  %v1046_v57 = vadd.f32 %v1417_v53, %v1611_v40  ;;  %v629_v58 = vpop.f32.mrb[27].mxu0  ;;  %v757_v59 = vpop.f32.mrb[27].mxu1 }
 0x14e   :  { %v1075_v60 = vmax.f32 %v1011_v50, 0.0  ;;  %v1107_v61 = vmax.f32 %v1043_v51, 0.0  ;;  %v1012_v62 = vadd.f32 %v1611_v40, %v629_v58  ;;  %v1044_v63 = vadd.f32 %v1611_v40, %v757_v59 }
 0x14f   :  { %v1141_v0 = vmin.f32 %v1077_v54, 6.0  ;;  %v1173_v1 = vmin.f32 %v1109_v55, 6.0  ;;  %v1078_v2 = vmax.f32 %v1014_v56, 0.0  ;;  %v1110_v3 = vmax.f32 %v1046_v57, 0.0 }
 0x150   :  { %v1139_v4 = vmin.f32 %v1075_v60, 6.0  ;;  %v1171_v5 = vmin.f32 %v1107_v61, 6.0  ;;  %v1076_v6 = vmax.f32 %v1012_v62, 0.0  ;;  %v1108_v7 = vmax.f32 %v1044_v63, 0.0 }
 0x151   :  { %1205 = vst [vmem:[#allocation8 + $0xd0] sm:$0xff] %v1141_v0  ;;  %1237 = vst [vmem:[#allocation8 + $0x1d0] sm:$0xff] %v1173_v1  ;;  %v1142_v8 = vmin.f32 %v1078_v2, 6.0  ;;  %v1174_v9 = vmin.f32 %v1110_v3, 6.0 }
 0x152   :  { %1203 = vst [vmem:[#allocation8 + $0xc0] sm:$0xff] %v1139_v4  ;;  %1235 = vst [vmem:[#allocation8 + $0x1c0] sm:$0xff] %v1171_v5  ;;  %v1140_v10 = vmin.f32 %v1076_v6, 6.0  ;;  %v1172_v11 = vmin.f32 %v1108_v7, 6.0  ;;  %v1388_v12 = vpop.f32.mrb[28].mxu0  ;;  %v1420_v13 = vpop.f32.mrb[28].mxu1 }
 0x153   :  { %1206 = vst [vmem:[#allocation8 + $0xd8] sm:$0xff] %v1142_v8  ;;  %1238 = vst [vmem:[#allocation8 + $0x1d8] sm:$0xff] %v1174_v9  ;;  %v1017_v14 = vadd.f32 %v1388_v12, %v1611_v40  ;;  %v1049_v15 = vadd.f32 %v1420_v13, %v1611_v40  ;;  %v642_v16 = vpop.f32.mrb[29].mxu0  ;;  %v770_v17 = vpop.f32.mrb[29].mxu1 }
 0x154   :  { %1204 = vst [vmem:[#allocation8 + $0xc8] sm:$0xff] %v1140_v10  ;;  %1236 = vst [vmem:[#allocation8 + $0x1c8] sm:$0xff] %v1172_v11  ;;  %v1015_v18 = vadd.f32 %v1611_v40, %v642_v16  ;;  %v1047_v19 = vadd.f32 %v1611_v40, %v770_v17  ;;  %v1389_v20 = vpop.f32.mrb[30].mxu0  ;;  %v1421_v21 = vpop.f32.mrb[30].mxu1 }
 0x155   :  { %v1081_v22 = vmax.f32 %v1017_v14, 0.0  ;;  %v1113_v23 = vmax.f32 %v1049_v15, 0.0  ;;  %v1018_v24 = vadd.f32 %v1389_v20, %v1611_v40  ;;  %v1050_v25 = vadd.f32 %v1421_v21, %v1611_v40  ;;  %v645_v26 = vpop.f32.mrb[31].mxu0  ;;  %v773_v27 = vpop.f32.mrb[31].mxu1 }
 0x156   :  { %v1079_v28 = vmax.f32 %v1015_v18, 0.0  ;;  %v1111_v29 = vmax.f32 %v1047_v19, 0.0  ;;  %v1016_v30 = vadd.f32 %v1611_v40, %v645_v26  ;;  %v1048_v31 = vadd.f32 %v1611_v40, %v773_v27 }
 0x157   :  { %v1145_v32 = vmin.f32 %v1081_v22, 6.0  ;;  %v1177_v33 = vmin.f32 %v1113_v23, 6.0  ;;  %v1082_v34 = vmax.f32 %v1018_v24, 0.0  ;;  %v1114_v35 = vmax.f32 %v1050_v25, 0.0 }
 0x158   :  { %v1143_v36 = vmin.f32 %v1079_v28, 6.0  ;;  %v1175_v37 = vmin.f32 %v1111_v29, 6.0  ;;  %v1080_v38 = vmax.f32 %v1016_v30, 0.0  ;;  %v1112_v39 = vmax.f32 %v1048_v31, 0.0 }
 0x159   :  { %1209 = vst [vmem:[#allocation8 + $0xf0] sm:$0xff] %v1145_v32  ;;  %1241 = vst [vmem:[#allocation8 + $0x1f0] sm:$0xff] %v1177_v33  ;;  %v1146_v41 = vmin.f32 %v1082_v34, 6.0  ;;  %v1178_v42 = vmin.f32 %v1114_v35, 6.0 }
 0x15a   :  { %1207 = vst [vmem:[#allocation8 + $0xe0] sm:$0xff] %v1143_v36  ;;  %1239 = vst [vmem:[#allocation8 + $0x1e0] sm:$0xff] %v1175_v37  ;;  %v1144_v43 = vmin.f32 %v1080_v38, 6.0  ;;  %v1176_v44 = vmin.f32 %v1112_v39, 6.0 }
 0x15b   :  { %1210 = vst [vmem:[#allocation8 + $0xf8] sm:$0xff] %v1146_v41  ;;  %1242 = vst [vmem:[#allocation8 + $0x1f8] sm:$0xff] %v1178_v42 }
 0x15c   :  { %1208 = vst [vmem:[#allocation8 + $0xe8] sm:$0xff] %v1144_v43  ;;  %1240 = vst [vmem:[#allocation8 + $0x1e8] sm:$0xff] %v1176_v44 }
 0x15d   :  { %1540 = shalt.err (!%p1537_p6)
}
 0x15e   :  { %s1541_s15 = scalar_lea.hbm %s1692_s3, 8192 }
 0x15f   :  { %p1542_p7 = scmp.ne.s32.totalorder %s1692_s3, %s1541_s15  ;;  %p1545_p8 = scmp.lt.u32.totalorder %s1541_s15, %s1692_s3 }
 0x161   :  { %p1547_p9 = pnand %p1545_p8, %p1542_p7 }
 0x163   :  { %1550 = shalt.err (!%p1547_p9)
}
 0x164   :  { %s1562_s20 = smov 128   ;;  %s1563_s21 = smov 8  }
 0x165   :  { %1254 = dma.vmem_to_hbm [thread:$0]  %s1249_s11, 8192, %s1692_s3, [#allocation5], %s1562_s20, %s1562_s20, %s1563_s21  }
 0x166   :  { %1555 = dma.done.wait [#allocation5], 8192  }
 0x167   :  { %1556 = vsyncadd [#allocation5], 4294959104 }
 0x168   :  { %1258 = vsyncpa [#allocation4], 1 }
 0x169   :  { %1259 = vsyncpa [#allocation7], 1 }
 0x16a   :  { %1260 = vsyncpa [#allocation5], 1 }

</bundles_post_ra>
